<compile_context>
chip_gen: v5e
topology: v5e:2x2
jax: 0.10.0
libtpu: 0.0.40
codegen_flags: <defaults>
</compile_context>

<pallas_src>
import jax
import jax.numpy as jnp
from jax.experimental import pallas as pl
from jax.experimental.pallas import tpu as pltpu

_LANES = 128            # lane-dense last dim -> fully unmasked vector stores
_MAX_BLOCK_ROWS = 1024  # 1024x128xf32 = 512 KiB/block; 7 streams x 2 buffers ~= 6.25 MiB


def _elementwise_kernel(x_ref, add_ref, sub_ref, mul_ref, div_ref, pow_ref, cmp_ref):
    x = x_ref[...]
    add_ref[...] = x + 2.0
    sub_ref[...] = x - 2.0
    mul_ref[...] = x * 2.0
    div_ref[...] = x * 0.5            # exact substitute for x / 2 in float
    pow_ref[...] = x * x              # exact substitute for x ** 2 in float
    cmp_ref[...] = (x > 1.0).astype(jnp.int8)   # mask kept as int8 in-kernel


@jax.jit
def pt_module_forward(x):
    """Pallas equivalent of PtModule.forward: (x+2, x-2, x*2, x/2, x**2, x>1)."""
    assert jnp.issubdtype(x.dtype, jnp.floating), "kernel assumes floating-point input"
    orig_shape = x.shape
    n = x.size

    # ---- lane-dense (rows, 128) layout; pad only up to the next lane multiple
    rows = pl.cdiv(n, _LANES)
    padded_n = rows * _LANES

    flat = x.reshape(-1)
    needs_pad = padded_n != n
    if needs_pad:                       # <= 127 extra elements, only for odd sizes
        flat = jnp.pad(flat, (0, padded_n - n))
    x2d = flat.reshape(rows, _LANES)

    # Block rows: multiple of 32 (full (32,128) int8 vreg packing; also covers
    # the 8-row f32 sublane requirement), capped so the double-buffered
    # footprint stays well inside the default scoped VMEM on v5e/v6e/v7x.
    block_rows = min(_MAX_BLOCK_ROWS, ((rows + 31) // 32) * 32)
    grid = (pl.cdiv(rows, block_rows),)   # ragged last block clipped by Pallas
    blk = lambda i: (i, 0)

    out_shapes = (
        jax.ShapeDtypeStruct((rows, _LANES), x.dtype),   # addition
        jax.ShapeDtypeStruct((rows, _LANES), x.dtype),   # subtraction
        jax.ShapeDtypeStruct((rows, _LANES), x.dtype),   # multiplication
        jax.ShapeDtypeStruct((rows, _LANES), x.dtype),   # division
        jax.ShapeDtypeStruct((rows, _LANES), x.dtype),   # power
        jax.ShapeDtypeStruct((rows, _LANES), jnp.int8),  # comparison mask
    )

    add, sub, mul, div, pw, cmp_i8 = pl.pallas_call(
        _elementwise_kernel,
        grid=grid,
        in_specs=[pl.BlockSpec((block_rows, _LANES), blk)],
        out_specs=tuple(pl.BlockSpec((block_rows, _LANES), blk) for _ in out_shapes),
        out_shape=out_shapes,
        compiler_params=pltpu.CompilerParams(
            dimension_semantics=("parallel",),   # shard grid across TCs on v7x
        ),
        cost_estimate=pl.CostEstimate(
            flops=6 * padded_n,           # 5 arith + 1 compare per element
            transcendentals=0,
            bytes_accessed=25 * padded_n, # 4B in + 5*4B f32 out + 1B int8 out
        ),
    )(x2d)

    def unflatten(a):
        if needs_pad:
            return a.reshape(-1)[:n].reshape(orig_shape)
        return a.reshape(orig_shape)      # pure reshape: no copy on the fast path

    return (
        unflatten(add),
        unflatten(sub),
        unflatten(mul),
        unflatten(div),
        unflatten(pw),
        unflatten(cmp_i8).astype(jnp.bool_),
    )


def _check(x):
    outs = jax.block_until_ready(pt_module_forward(x))
    ref = (x + 2, x - 2, x * 2, x / 2, x ** 2, x > 1)
    for got, want in zip(outs, ref):
        assert got.shape == want.shape, (got.shape, want.shape)
        assert got.dtype == want.dtype, (got.dtype, want.dtype)
        if got.dtype == jnp.bool_:
            assert bool(jnp.all(got == want))
        else:
            assert bool(jnp.allclose(got, want, atol=1e-6))


if __name__ == "__main__":
    key = jax.random.PRNGKey(0)
    k0, k1, k2 = jax.random.split(key, 3)

    # Small NCHW input consistent with the module (elementwise, shape-agnostic).
    x = jax.random.normal(k0, (2, 4, 16, 16), dtype=jnp.float32) * 2.0
    _check(x)                                                       # single-block, no-copy path

    # Extra coverage: multi-block grid path and a padded (odd-size) path.
    _check(jax.random.normal(k1, (8, 8, 64, 64), dtype=jnp.float32) * 2.0)
    _check(jax.random.normal(k2, (3, 5, 7, 11), dtype=jnp.float32) * 2.0)

    print("KERNEL_OK")
</pallas_src>

<mosaic_0001>
module attributes {stable_mosaic.version = 11 : i64} {
  func.func @_elementwise_kernel(%arg0: i32, %arg1: memref<32x128xf32, #tpu.memory_space<vmem>>, %arg2: memref<32x128xf32, #tpu.memory_space<vmem>>, %arg3: memref<32x128xf32, #tpu.memory_space<vmem>>, %arg4: memref<32x128xf32, #tpu.memory_space<vmem>>, %arg5: memref<32x128xf32, #tpu.memory_space<vmem>>, %arg6: memref<32x128xf32, #tpu.memory_space<vmem>>, %arg7: memref<32x128xi8, #tpu.memory_space<vmem>>) attributes {dimension_semantics = [#tpu.dimension_semantics<parallel>], iteration_bounds = array<i64: 1>, scalar_prefetch = 0 : i64, scratch_operands = 0 : i64, tpu.core_type = #tpu.core_type<tc>, window_params = [{transform_indices = @transform_0, window_bounds = array<i64: 32, 128>}, {transform_indices = @transform_1, window_bounds = array<i64: 32, 128>}, {transform_indices = @transform_2, window_bounds = array<i64: 32, 128>}, {transform_indices = @transform_3, window_bounds = array<i64: 32, 128>}, {transform_indices = @transform_4, window_bounds = array<i64: 32, 128>}, {transform_indices = @transform_5, window_bounds = array<i64: 32, 128>}, {transform_indices = @transform_6, window_bounds = array<i64: 32, 128>}]} {
    %c0 = arith.constant 0 : index
    %c0_0 = arith.constant 0 : index
    %0 = vector.load %arg1[%c0, %c0_0] : memref<32x128xf32, #tpu.memory_space<vmem>>, vector<32x128xf32>
    %cst = arith.constant 2.000000e+00 : f32
    %1 = vector.broadcast %cst : f32 to vector<32x128xf32>
    %2 = arith.addf %0, %1 : vector<32x128xf32>
    %c0_1 = arith.constant 0 : index
    %c0_2 = arith.constant 0 : index
    %3 = vector.load %arg2[%c0_1, %c0_2] : memref<32x128xf32, #tpu.memory_space<vmem>>, vector<32x128xf32>
    tpu.vector_store %arg2[%c0_1, %c0_2], %2 {strides = array<i32>} : memref<32x128xf32, #tpu.memory_space<vmem>>, vector<32x128xf32>,
    %cst_3 = arith.constant 2.000000e+00 : f32
    %4 = vector.broadcast %cst_3 : f32 to vector<32x128xf32>
    %5 = arith.subf %0, %4 : vector<32x128xf32>
    %c0_4 = arith.constant 0 : index
    %c0_5 = arith.constant 0 : index
    %6 = vector.load %arg3[%c0_4, %c0_5] : memref<32x128xf32, #tpu.memory_space<vmem>>, vector<32x128xf32>
    tpu.vector_store %arg3[%c0_4, %c0_5], %5 {strides = array<i32>} : memref<32x128xf32, #tpu.memory_space<vmem>>, vector<32x128xf32>,
    %cst_6 = arith.constant 2.000000e+00 : f32
    %7 = vector.broadcast %cst_6 : f32 to vector<32x128xf32>
    %8 = arith.mulf %0, %7 : vector<32x128xf32>
    %c0_7 = arith.constant 0 : index
    %c0_8 = arith.constant 0 : index
    %9 = vector.load %arg4[%c0_7, %c0_8] : memref<32x128xf32, #tpu.memory_space<vmem>>, vector<32x128xf32>
    tpu.vector_store %arg4[%c0_7, %c0_8], %8 {strides = array<i32>} : memref<32x128xf32, #tpu.memory_space<vmem>>, vector<32x128xf32>,
    %cst_9 = arith.constant 5.000000e-01 : f32
    %10 = vector.broadcast %cst_9 : f32 to vector<32x128xf32>
    %11 = arith.mulf %0, %10 : vector<32x128xf32>
    %c0_10 = arith.constant 0 : index
    %c0_11 = arith.constant 0 : index
    %12 = vector.load %arg5[%c0_10, %c0_11] : memref<32x128xf32, #tpu.memory_space<vmem>>, vector<32x128xf32>
    tpu.vector_store %arg5[%c0_10, %c0_11], %11 {strides = array<i32>} : memref<32x128xf32, #tpu.memory_space<vmem>>, vector<32x128xf32>,
    %13 = arith.mulf %0, %0 : vector<32x128xf32>
    %c0_12 = arith.constant 0 : index
    %c0_13 = arith.constant 0 : index
    %14 = vector.load %arg6[%c0_12, %c0_13] : memref<32x128xf32, #tpu.memory_space<vmem>>, vector<32x128xf32>
    tpu.vector_store %arg6[%c0_12, %c0_13], %13 {strides = array<i32>} : memref<32x128xf32, #tpu.memory_space<vmem>>, vector<32x128xf32>,
    %cst_14 = arith.constant 1.000000e+00 : f32
    %15 = vector.broadcast %cst_14 : f32 to vector<32x128xf32>
    %16 = arith.cmpf ogt, %0, %15 : vector<32x128xf32>
    %17 = arith.extui %16 : vector<32x128xi1> to vector<32x128xi8>
    %c0_15 = arith.constant 0 : index
    %c0_16 = arith.constant 0 : index
    %18 = vector.load %arg7[%c0_15, %c0_16] : memref<32x128xi8, #tpu.memory_space<vmem>>, vector<32x128xi8>
    tpu.vector_store %arg7[%c0_15, %c0_16], %17 {strides = array<i32>} : memref<32x128xi8, #tpu.memory_space<vmem>>, vector<32x128xi8>,
    return
  }
  func.func @transform_0(%arg0: i32) -> (i32, i32) {
    %c0_i32 = arith.constant 0 : i32
    %c0_i32_0 = arith.constant 0 : i32
    return %arg0, %c0_i32 : i32, i32
  }
  func.func @transform_1(%arg0: i32) -> (i32, i32) {
    %c0_i32 = arith.constant 0 : i32
    %c0_i32_0 = arith.constant 0 : i32
    return %arg0, %c0_i32 : i32, i32
  }
  func.func @transform_2(%arg0: i32) -> (i32, i32) {
    %c0_i32 = arith.constant 0 : i32
    %c0_i32_0 = arith.constant 0 : i32
    return %arg0, %c0_i32 : i32, i32
  }
  func.func @transform_3(%arg0: i32) -> (i32, i32) {
    %c0_i32 = arith.constant 0 : i32
    %c0_i32_0 = arith.constant 0 : i32
    return %arg0, %c0_i32 : i32, i32
  }
  func.func @transform_4(%arg0: i32) -> (i32, i32) {
    %c0_i32 = arith.constant 0 : i32
    %c0_i32_0 = arith.constant 0 : i32
    return %arg0, %c0_i32 : i32, i32
  }
  func.func @transform_5(%arg0: i32) -> (i32, i32) {
    %c0_i32 = arith.constant 0 : i32
    %c0_i32_0 = arith.constant 0 : i32
    return %arg0, %c0_i32 : i32, i32
  }
  func.func @transform_6(%arg0: i32) -> (i32, i32) {
    %c0_i32 = arith.constant 0 : i32
    %c0_i32_0 = arith.constant 0 : i32
    return %arg0, %c0_i32 : i32, i32
  }
}

</mosaic_0001>

<bundles_post_ra>
// kernel: pt_module_forward.1
= control target key start
LH: loop header
LB: loop body
LE: loop exit
PB: predicated region body
PF: predicated region fallthrough
CT: control target
= control target key end

     0   :  { %v362_v8 = vmov 0   ;;  %s443_s0 = inlined_call_operand.vmem [shape: f32[16,128], index: 0, kind: input, shape index: {}]   ;;  %s444_s1 = inlined_call_operand.vmem [shape: f32[16,128], index: 1, kind: output, shape index: {0}]   ;;  %s445_s2 = inlined_call_operand.vmem [shape: f32[16,128], index: 2, kind: output, shape index: {1}]   ;;  %s446_s3 = inlined_call_operand.vmem [shape: f32[16,128], index: 3, kind: output, shape index: {2}]   ;;  %s447_s4 = inlined_call_operand.vmem [shape: f32[16,128], index: 4, kind: output, shape index: {3}]   ;;  %s448_s5 = inlined_call_operand.vmem [shape: f32[16,128], index: 5, kind: output, shape index: {4}]   ;;  %s449_s6 = inlined_call_operand.vmem [shape: s8[16,128], index: 6, kind: output, shape index: {5}]  }
   0x1   :  { %v16_v0 = vld [vmem:[%s443_s0] sm:$0xff]  ;;  %v17_v1 = vld [vmem:[%s443_s0 + $0x8] sm:$0xff]  ;;  %v18_v2 = vld [vmem:[%s443_s0 + $0x10] sm:$0xff] }
   0x2   :  { %v19_v3 = vld [vmem:[%s443_s0 + $0x18] sm:$0xff]  ;;  %vm60_vm0 = vcmp.gt.f32.partialorder %v16_v0, 1.0  ;;  %vm61_vm1 = vcmp.gt.f32.partialorder %v17_v1, 1.0  ;;  %vm62_vm2 = vcmp.gt.f32.partialorder %v18_v2, 1.0  ;;  %v20_v4 = vadd.f32 2.0, %v16_v0 }
   0x3   :  { %vm63_vm3 = vcmp.gt.f32.partialorder %v19_v3, 1.0  ;;  %vm64_vm4 = vmpackc.low %vm61_vm1, %vm60_vm0  ;;  %v21_v5 = vadd.f32 2.0, %v17_v1  ;;  %v357_v6 = vadd.f32 -2.0, %v16_v0  ;;  %v358_v7 = vadd.f32 -2.0, %v17_v1 }
   0x4   :  { %vm65_vm5 = vmpackc.low %vm63_vm3, %vm62_vm2  ;;  %v66_v9 = vsel %vm64_vm4, 16711935, %v362_v8  ;;  %120 = vst [vmem:[%s444_s1] sm:$0xff] %v20_v4  ;;  %v36_v10 = vmul.f32 2.0, %v16_v0  ;;  %v37_v12 = vmul.f32 2.0, %v17_v1  ;;  %v44_v14 = vmul.f32 0.5, %v16_v0 }
   0x5   :  { %v67_v11 = vsel %vm65_vm5, 16711935, %v362_v8  ;;  %122 = vst [vmem:[%s444_s1 + $0x8] sm:$0xff] %v21_v5  ;;  %v45_v15 = vmul.f32 0.5, %v17_v1  ;;  %v52_v16 = vmul.f32 %v16_v0, %v16_v0  ;;  %v53_v18 = vmul.f32 %v17_v1, %v17_v1 }
   0x6   :  { %v68_v13 = vpack.c.b8 %v67_v11, %v66_v9  ;;  %159 = vst [vmem:[%s445_s2] sm:$0xff] %v357_v6 }
   0x7   :  { %161 = vst [vmem:[%s445_s2 + $0x8] sm:$0xff] %v358_v7 }
   0x8   :  { %vm69_vm6 = vnez %v68_v13  ;;  %198 = vst [vmem:[%s446_s3] sm:$0xff] %v36_v10 }
   0x9   :  { %v70_v17 = vsel %vm69_vm6, 16843009, %v362_v8  ;;  %200 = vst [vmem:[%s446_s3 + $0x8] sm:$0xff] %v37_v12 }
   0xa   :  { %v71_v19 = vunpack.c.0.s8 %v70_v17  ;;  %v72_v20 = vunpack.c.1.s8 %v70_v17  ;;  %237 = vst [vmem:[%s447_s4] sm:$0xff] %v44_v14 }
   0xb   :  { %239 = vst [vmem:[%s447_s4 + $0x8] sm:$0xff] %v45_v15 }
   0xc   :  { %v75_v21 = vpack.c.b16 %v71_v19, %v71_v19  ;;  %v77_v22 = vpack.c.b16 %v72_v20, %v72_v20  ;;  %276 = vst [vmem:[%s448_s5] sm:$0xff] %v52_v16 }
   0xd   :  { %278 = vst [vmem:[%s448_s5 + $0x8] sm:$0xff] %v53_v18 }
   0xe   :  { %v76_v23 = vpack.c.b8 %v75_v21, %v75_v21  ;;  %v78_v24 = vpack.c.b8 %v77_v22, %v77_v22 }
  0x10   :  { %83 = vst [vmem:[#allocation7] sm:$0x3] %v76_v23 }
  0x11   :  { %84 = vst [vmem:[#allocation7 + $0x2] sm:$0x3] %v78_v24 }
  0x18   :  { %v300_v25 = vld [vmem:[#allocation7] sm:$0xf]  }
  0x19   :  { %301 = vst [vmem:[%s449_s6] sm:$0xf] %v300_v25  }

</bundles_post_ra>
